<compile_context>
chip_gen: v7x
topology: tpu7x:2x2x1
jax: 0.10.0
libtpu: 0.0.40
codegen_flags: <defaults>
</compile_context>

<pallas_src>
import functools

import jax
import jax.numpy as jnp
from jax.experimental import pallas as pl
from jax.experimental.pallas import tpu as pltpu


def _round_up(v, m):
    return (v + m - 1) // m * m


def _tile_and_vmem_budget():
    """(target_tile_bytes, vmem_limit_bytes), generation-aware.

    v7x has only 64 MiB VMEM per TensorCore, so use ~2 MiB tiles / 40 MiB
    scoped limit there (and whenever the query fails -- conservative default).
    v5e/v6e (128 MiB VMEM) can afford 4 MiB / 48 MiB, though ~1-2 MiB tiles
    already sit near the HBM roofline for this memory-bound kernel.
    """
    vmem_cap = 0
    try:
        vmem_cap = int(pltpu.get_tpu_info().vmem_capacity_bytes)
    except Exception:
        vmem_cap = 0
    if vmem_cap >= 100 * 1024 * 1024:        # v5e / v6e (128 MiB VMEM)
        return 4 * 1024 * 1024, 48 * 1024 * 1024
    return 2 * 1024 * 1024, 40 * 1024 * 1024  # v7x / unknown: conservative


def _choose_row_tile(bc, padded_row_bytes, target_tile_bytes, min_steps=8):
    """Rows per block: as many as fit the f32 tile budget, capped so the
    'parallel' grid axis has >= min_steps (preferably an even number of)
    steps whenever bc allows."""
    rows = max(1, int(target_tile_bytes // max(1, padded_row_bytes)))
    rows = min(rows, bc)
    if bc >= min_steps:
        rows = min(rows, max(1, bc // min_steps))
    # Nudge towards an even step count (balances v7x's two TensorCores).
    if pl.cdiv(bc, rows) % 2 == 1:
        for r in range(rows - 1, max(0, rows - 9), -1):
            if pl.cdiv(bc, r) % 2 == 0:
                rows = r
                break
    return rows


def _simam_kernel(x_ref, o_ref, *, inv_n, inv_hw, e_lambda):
    """One (row_tile, H, W) block; each row is one channel's full spatial plane."""
    x = x_ref[...].astype(jnp.float32)

    # Reductions over the logical (H, W) plane only -- padded lanes never
    # enter the sums, so no manual masking is required.
    def _plane_sum(v):
        return jnp.sum(jnp.sum(v, axis=-1, keepdims=True), axis=-2, keepdims=True)

    mu = _plane_sum(x) * inv_hw
    d = x - mu
    d2 = d * d
    s = _plane_sum(d2)                      # sum of squared deviations

    # y = d2 / (4 * (s / n + e_lambda)) + 0.5 with n = H*W - 1.
    denom = 4.0 * (s * inv_n + e_lambda)
    y = d2 * pl.reciprocal(denom, approx=False) + 0.5

    # sigmoid(y) == 0.5 * tanh(0.5 * y) + 0.5 : one EUP op instead of
    # exp + exact divide (saves VALU slots where v7x can be VPU-bound).
    gate = 0.5 * jnp.tanh(0.5 * y) + 0.5
    o_ref[...] = (x * gate).astype(o_ref.dtype)


def simam(x, e_lambda=1e-4, row_tile=None, vmem_limit_bytes=None):
    """SimAM forward. x: (B, C, H, W) array, any float dtype."""
    b, c, h, w = x.shape
    bc = b * c
    hw = h * w

    # Leading-dims-only reshape: layout-free (no HBM relayout copy).
    x3d = x.reshape(bc, h, w)

    target_tile_bytes, default_vmem_limit = _tile_and_vmem_budget()
    if vmem_limit_bytes is None:
        vmem_limit_bytes = default_vmem_limit

    # f32 VMEM footprint of one row's (H, W) plane after (sublane, lane)
    # padding -- what the in-kernel f32 temporaries actually occupy.
    padded_row_bytes = _round_up(h, 8) * _round_up(w, 128) * 4
    if row_tile is None:
        row_tile = _choose_row_tile(bc, padded_row_bytes, target_tile_bytes)
    row_tile = max(1, min(int(row_tile), bc))
    # TODO(synk): if padded_row_bytes alone exceeds the budget (e.g. 1024x1024
    # planes), add a second 'arbitrary' grid axis over H with scratch
    # accumulators instead of relying on a single oversized block.

    grid = (pl.cdiv(bc, row_tile),)

    n = hw - 1
    # n == 0 (1x1 spatial): PyTorch's 0/0 yields NaN; mirror that instead of a
    # Python ZeroDivisionError at trace time.
    inv_n = (1.0 / n) if n > 0 else float("nan")

    kernel = functools.partial(
        _simam_kernel,
        inv_n=inv_n,
        inv_hw=1.0 / hw,
        e_lambda=float(e_lambda),
    )

    out3d = pl.pallas_call(
        kernel,
        out_shape=jax.ShapeDtypeStruct((bc, h, w), x.dtype),
        grid_spec=pltpu.PrefetchScalarGridSpec(
            num_scalar_prefetch=0,
            grid=grid,
            in_specs=[pl.BlockSpec((row_tile, h, w), lambda i: (i, 0, 0))],
            out_specs=pl.BlockSpec((row_tile, h, w), lambda i: (i, 0, 0)),
        ),
        compiler_params=pltpu.CompilerParams(
            dimension_semantics=("parallel",),
            vmem_limit_bytes=vmem_limit_bytes,
        ),
    )(x3d)

    # Leading-dims-only reshape back: layout-free.
    return out3d.reshape(b, c, h, w)


def _simam_ref(x, e_lambda=1e-4):
    """Pure-JAX reference mirroring the PyTorch forward."""
    b, c, h, w = x.shape
    n = w * h - 1
    xf = x.astype(jnp.float32)
    mu = jnp.mean(xf, axis=(2, 3), keepdims=True)
    d2 = (xf - mu) ** 2
    y = d2 / (4.0 * (jnp.sum(d2, axis=(2, 3), keepdims=True) / n + e_lambda)) + 0.5
    return (xf * jax.nn.sigmoid(y)).astype(x.dtype)


if __name__ == "__main__":
    key = jax.random.PRNGKey(0)
    k0, k1 = jax.random.split(key)

    # Primary example: B=2, C=4, H=W=16 (lane-padded W, 8 even grid steps).
    x = jax.random.normal(k0, (2, 4, 16, 16), dtype=jnp.float32)
    out = jax.block_until_ready(simam(x, e_lambda=1e-4))
    ref = _simam_ref(x, e_lambda=1e-4)
    assert out.shape == x.shape and out.dtype == x.dtype
    assert jnp.allclose(out, ref, atol=1e-5, rtol=1e-5), "mismatch vs reference"

    # Secondary check: odd spatial extents + partial last row-block (B*C=3).
    x2 = jax.random.normal(k1, (1, 3, 7, 9), dtype=jnp.float32)
    out2 = jax.block_until_ready(simam(x2, e_lambda=1e-4))
    ref2 = _simam_ref(x2, e_lambda=1e-4)
    assert jnp.allclose(out2, ref2, atol=1e-5, rtol=1e-5), "mismatch vs reference (odd)"

    print("KERNEL_OK")
</pallas_src>

<mosaic_0001>
module attributes {stable_mosaic.version = 11 : i64} {
  func.func @_simam_kernel(%arg0: i32, %arg1: memref<1x16x16xf32, #tpu.memory_space<vmem>>, %arg2: memref<1x16x16xf32, #tpu.memory_space<vmem>>) attributes {dimension_semantics = [#tpu.dimension_semantics<parallel>], iteration_bounds = array<i64: 8>, scalar_prefetch = 0 : i64, scratch_operands = 0 : i64, tpu.core_type = #tpu.core_type<tc>, window_params = [{transform_indices = @transform_0, window_bounds = array<i64: 1, 16, 16>}, {transform_indices = @transform_1, window_bounds = array<i64: 1, 16, 16>}]} {
    %c0 = arith.constant 0 : index
    %c0_0 = arith.constant 0 : index
    %c0_1 = arith.constant 0 : index
    %0 = vector.load %arg1[%c0, %c0_0, %c0_1] : memref<1x16x16xf32, #tpu.memory_space<vmem>>, vector<1x16x16xf32>
    %cst = arith.constant dense<0.000000e+00> : vector<1x16xf32>
    %1 = vector.multi_reduction <add>, %0, %cst [2] : vector<1x16x16xf32> to vector<1x16xf32>
    %2 = vector.shape_cast %1 : vector<1x16xf32> to vector<1x16x1xf32>
    %cst_2 = arith.constant dense<0.000000e+00> : vector<1x1xf32>
    %3 = vector.multi_reduction <add>, %2, %cst_2 [1] : vector<1x16x1xf32> to vector<1x1xf32>
    %4 = vector.shape_cast %3 : vector<1x1xf32> to vector<1x1x1xf32>
    %cst_3 = arith.constant 3.906250e-03 : f32
    %5 = vector.broadcast %cst_3 : f32 to vector<1x1x1xf32>
    %6 = arith.mulf %4, %5 : vector<1x1x1xf32>
    %7 = vector.broadcast %6 : vector<1x1x1xf32> to vector<1x16x16xf32>
    %8 = arith.subf %0, %7 : vector<1x16x16xf32>
    %9 = arith.mulf %8, %8 : vector<1x16x16xf32>
    %cst_4 = arith.constant dense<0.000000e+00> : vector<1x16xf32>
    %10 = vector.multi_reduction <add>, %9, %cst_4 [2] : vector<1x16x16xf32> to vector<1x16xf32>
    %11 = vector.shape_cast %10 : vector<1x16xf32> to vector<1x16x1xf32>
    %cst_5 = arith.constant dense<0.000000e+00> : vector<1x1xf32>
    %12 = vector.multi_reduction <add>, %11, %cst_5 [1] : vector<1x16x1xf32> to vector<1x1xf32>
    %13 = vector.shape_cast %12 : vector<1x1xf32> to vector<1x1x1xf32>
    %cst_6 = arith.constant 0.00392156886 : f32
    %14 = vector.broadcast %cst_6 : f32 to vector<1x1x1xf32>
    %15 = arith.mulf %13, %14 : vector<1x1x1xf32>
    %cst_7 = arith.constant 9.99999974E-5 : f32
    %16 = vector.broadcast %cst_7 : f32 to vector<1x1x1xf32>
    %17 = arith.addf %15, %16 : vector<1x1x1xf32>
    %cst_8 = arith.constant 4.000000e+00 : f32
    %18 = vector.broadcast %cst_8 : f32 to vector<1x1x1xf32>
    %19 = arith.mulf %18, %17 : vector<1x1x1xf32>
    %20 = tpu.reciprocal %19 : vector<1x1x1xf32> -> vector<1x1x1xf32>
    %21 = vector.broadcast %20 : vector<1x1x1xf32> to vector<1x16x16xf32>
    %22 = arith.mulf %9, %21 : vector<1x16x16xf32>
    %cst_9 = arith.constant 5.000000e-01 : f32
    %23 = vector.broadcast %cst_9 : f32 to vector<1x16x16xf32>
    %24 = arith.addf %22, %23 : vector<1x16x16xf32>
    %cst_10 = arith.constant 5.000000e-01 : f32
    %25 = vector.broadcast %cst_10 : f32 to vector<1x16x16xf32>
    %26 = arith.mulf %25, %24 : vector<1x16x16xf32>
    %27 = math.tanh %26 : vector<1x16x16xf32>
    %cst_11 = arith.constant 5.000000e-01 : f32
    %28 = vector.broadcast %cst_11 : f32 to vector<1x16x16xf32>
    %29 = arith.mulf %28, %27 : vector<1x16x16xf32>
    %cst_12 = arith.constant 5.000000e-01 : f32
    %30 = vector.broadcast %cst_12 : f32 to vector<1x16x16xf32>
    %31 = arith.addf %29, %30 : vector<1x16x16xf32>
    %32 = arith.mulf %0, %31 : vector<1x16x16xf32>
    %c0_13 = arith.constant 0 : index
    %c0_14 = arith.constant 0 : index
    %c0_15 = arith.constant 0 : index
    %33 = vector.load %arg2[%c0_13, %c0_14, %c0_15] : memref<1x16x16xf32, #tpu.memory_space<vmem>>, vector<1x16x16xf32>
    tpu.vector_store %arg2[%c0_13, %c0_14, %c0_15], %32 {strides = array<i32>} : memref<1x16x16xf32, #tpu.memory_space<vmem>>, vector<1x16x16xf32>,
    return
  }
  func.func @transform_0(%arg0: i32) -> (i32, i32, i32) {
    %c0_i32 = arith.constant 0 : i32
    %c0_i32_0 = arith.constant 0 : i32
    %c0_i32_1 = arith.constant 0 : i32
    return %arg0, %c0_i32, %c0_i32_0 : i32, i32, i32
  }
  func.func @transform_1(%arg0: i32) -> (i32, i32, i32) {
    %c0_i32 = arith.constant 0 : i32
    %c0_i32_0 = arith.constant 0 : i32
    %c0_i32_1 = arith.constant 0 : i32
    return %arg0, %c0_i32, %c0_i32_0 : i32, i32, i32
  }
}

</mosaic_0001>

<bundles_post_ra>
// kernel: tpu_custom_call.1
= control target key start
LH: loop header
LB: loop body
LE: loop exit
PB: predicated region body
PF: predicated region fallthrough
CT: control target
= control target key end

     0   :  { %6 = vsyncpa [#allocation3], 0  ;;  %s632_s0 = inlined_call_operand.hbm [shape: f32[8,16,16], index: 0, kind: input, shape index: {}]   ;;  %s633_s1 = inlined_call_operand.hbm [shape: f32[8,16,16], index: 1, kind: output, shape index: {}]  }
   0x1   :  { %8 = vsyncpa [#allocation3 + $0x1], 0 }
   0x2   :  { %9 = vsyncpa [#allocation4], 0 }
   0x3   :  { %11 = vsyncpa [#allocation4 + $0x1], 0  ;;  %s462_s6 = smov 0   ;;  %s464_s7 = smov 0  }
   0x4   :  { %s466_s8 = smov 0   ;;  %s468_s9 = smov 0  }
   0x5 LB: > { %s483_s10 = sadd.s32 4294967295, %s444_s9   ;;  %s276_s11 = sadd.s32 4294967294, %s444_s9   ;;  %s444_s9 = sphi %s468_s9, %s645_s9   ;;  %s440_s8 = sphi %s466_s8, %s644_s8   ;;  %s436_s7 = sphi %s464_s7, %s643_s7   ;;  %s432_s6 = sphi %s462_s6, %s642_s6  }
   0x6   : > { %s487_s12 = sadd.s32 1, %s444_s9   ;;  %s24_s13 = sadd.s32 1, %s440_s8 }
   0x7   : > { %s21_s14 = ssub.s32 %s444_s9, %s487_s12  ;;  %p31_p0 = scmp.ne.s32.totalorder %s440_s8, %s436_s7 }
   0x8   : > { %p22_p1 = scmp.eq.s32.totalorder %s21_s14, 0  ;;  %p32_p2 = scmp.eq.s32.totalorder %s444_s9, 0 }
   0x9   : > { %p37_p3 = scmp.ne.s32.totalorder %s436_s7, %s432_s6  ;;  %p38_p4 = scmp.eq.s32.totalorder %s483_s10, 0 }
   0xa   : > { %s499_s15 = scalar_select %p22_p1, %s440_s8, %s24_s13  }
   0xb   : > { %p501_p5 = por %p32_p2, %p31_p0  ;;  %p505_p6 = por %p38_p4, %p37_p3 }
   0xc   : > { %p61_p7 = scmp.eq.s32.totalorder %s483_s10, 7  ;;  %p67_p8 = scmp.eq.s32.totalorder %s276_s11, 7 }
   0xd   : > { %p304_p9 = scmp.lt.s32.totalorder %s444_s9, 8  ;;  %s87_s20 = sand.u32 1, %s440_s8  }
   0xe   : > { %p511_p10 = por %p61_p7, %p31_p0  ;;  %p515_p11 = por %p67_p8, %p37_p3 }
   0xf   : > { %s290_s21 = sshll.u32 %s444_s9, 8  ;;  %s279_s22 = sshll.u32 %s87_s20, 4 }
  0x10   : > { %s637_s18 = scalar_select %p511_p10, 1, 0 }
  0x11   : > { %s638_s19 = scalar_select %p515_p11, 1, 0 }
  0x12   : > { %s524_s25 = scalar_lea.hbm %s632_s0, %s290_s21  ;;  %s91_s26 = scalar_lea.vmem [#allocation2], %s279_s22 }
  0x13   : > { %s98_s27 = sshll.u32 %s91_s26, 4  ;;  %p528_p12 = pnand %p304_p9, %p501_p5  ;;  %s532_s27 = int_to_ptr.vmem [resolvable:$true] %s98_s27 }
  0x14   : > { %s534_s29 = scalar_lea.sflag [#allocation3], %s87_s20  ;;  %s348_s30 = scalar_lea.hbm %s524_s25, 256 }
  0x15   : > { %p349_p13 = scmp.ne.s32.totalorder %s524_s25, %s348_s30  ;;  %p350_p0 = pneg %p528_p12 }
  0x16   : > { %s353_s4 = scalar_lea.hbm %s632_s0, 2048  ;;  %p354_p3 = scmp.lt.u32.totalorder %s524_s25, %s632_s0 }
  0x17   : > { %p351_p1 = pnand %p350_p0, %p349_p13  ;;  %p355_p4 = scmp.lt.u32.totalorder %s353_s4, %s348_s30 }
  0x18   : > { %p357_p7 = scmp.lt.u32.totalorder %s348_s30, %s524_s25 }
  0x19   : > { %p352_p2 = pneg %p351_p1  ;;  %p356_p5 = por %p355_p4, %p354_p3 }
  0x1b   : > { %p358_p8 = por %p357_p7, %p356_p5 }
  0x1d   : > { %p359_p9 = pnand %p358_p8, %p352_p2 }
  0x1f   : > { %362 = shalt.err (!%p359_p9)
}
  0x20   : > { %s363_s13 = scalar_lea.vmem %s532_s27, 256  ;;  %s446_s14 = smov [#allocation2]  }
  0x21   : > { %p364_p13 = scmp.ne.s32.totalorder %s532_s27, %s363_s13  ;;  %s368_s16 = sshll.u32 %s446_s14, 4  ;;  %s369_s16 = int_to_ptr.vmem [resolvable:$false] %s368_s16 }
  0x22   : > { %s370_s20 = scalar_lea.vmem %s369_s16, 512  ;;  %p371_p10 = scmp.lt.s32.totalorder %s532_s27, %s369_s16 }
  0x23   : > { %p366_p1 = pnand %p364_p13, %p350_p0  ;;  %p372_p3 = scmp.lt.s32.totalorder %s370_s20, %s363_s13 }
  0x25   : > { %p367_p11 = pneg %p366_p1  ;;  %p373_p4 = por %p372_p3, %p371_p10 }
  0x27   : > { %p374_p5 = pnand %p373_p4, %p367_p11 }
  0x29   : > { %377 = shalt.err (!%p374_p5)
}
  0x2a   : > { %s447_s21 = smov 128   ;;  %s448_s22 = smov 8  }
  0x2b   : > { %299 = dma.hbm_to_vmem [thread:$0]  (!%p528_p12), %s524_s25, 256, %s532_s27, %s534_s29, %s447_s21, %s447_s21, %s448_s22  }
  0x2c   : > { %p282_p0 = scmp.ge.s32.totalorder %s444_s9, 1  ;;  %p106_p2 = scmp.lt.s32.totalorder %s444_s9, 9 }
  0x2e   : > { %p107_p7 = pnand %p282_p0, %p106_p2 }
  0x2f   : > { %s565_s23 = sand.u32 (!%p107_p7), 1, %s436_s7  }
  0x30   : > { %110 = sbr.rel (%p107_p7) target bundleno = 441 (0x1b9), region = 24  ;;  %s283_s24 = sshll.u32 (!%p107_p7), %s565_s23, 4 }
  0x31   : > { %s113_s26 = scalar_lea.sflag (!%p107_p7), [#allocation3], %s565_s23  ;;  %s116_s30 = scalar_lea.vmem (!%p107_p7), [#allocation2], %s283_s24 }
  0x37   : > { %423 = dma.done.wait (%p505_p6), %s113_s26, 256  }
  0x38   : > { %425 = vsyncadd (%p505_p6), %s113_s26, 4294967040  ;;  %vm137_vm0 = vcmask 130048   ;;  %v135_v0 = vld [vmem:[%s116_s30] sm:$0xff]  ;;  %v136_v1 = vld [vmem:[%s116_s30 + $0x8] sm:$0xff]  ;;  %s291_s17 = sshll.u32 %s483_s10, 8  ;;  %s134_s25 = scalar_lea.vmem [#allocation5], %s283_s24 }
  0x39   : > { %v138_v2 = vsel %vm137_vm0, %v135_v0, 0.0  ;;  %v141_v3 = vsel %vm137_vm0, %v136_v1, 0.0  ;;  %s203_s27 = sshll.u32 %s134_s25, 4  ;;  %s585_s2 = scalar_lea.hbm %s633_s1, %s291_s17  ;;  %s587_s27 = int_to_ptr.vmem [resolvable:$true] %s203_s27 }
  0x3a   : > { %139 = vadd.xlane.f32.xlu0 %v138_v2  ;;  %s190_s10 = scalar_lea.sflag [#allocation4], %s565_s23  ;;  %s378_s3 = scalar_lea.vmem %s587_s27, 256 }
  0x3b   : > { %p379_p6 = scmp.ne.s32.totalorder %s587_s27, %s378_s3  ;;  %p640_p10 = scmp.ne.s32.totalorder %s637_s18, 0 }
  0x3c   : > { %s449_s4 = smov [#allocation5]  }
  0x3d   : > { %p380_p11 = pnand %p379_p6, %p640_p10  ;;  %s382_s5 = sshll.u32 %s449_s4, 4  ;;  %s383_s5 = int_to_ptr.vmem [resolvable:$false] %s382_s5 }
  0x3e   : > { %142 = vadd.xlane.f32.xlu0 %v141_v3  ;;  %s384_s11 = scalar_lea.vmem %s383_s5, 512  ;;  %p385_p8 = scmp.lt.s32.totalorder %s587_s27, %s383_s5 }
  0x3f   : > { %p381_p12 = pneg %p380_p11  ;;  %p386_p9 = scmp.lt.s32.totalorder %s384_s11, %s378_s3 }
  0x41   : > { %p387_p13 = por %p386_p9, %p385_p8 }
  0x43   : > { %p388_p1 = pnand %p387_p13, %p381_p12 }
  0xc7   : > { %v140_v4 = vpop.xlane.xlu0 %139 }
  0xcb   : > { %v143_v5 = vpop.xlane.xlu0 %142 }
  0xcc   : > { %v144_v6 = vadd.f32 %v143_v5, %v140_v4 }
  0xce   : > { %v145_v7 = vrot.slane %v144_v6, 4 }
  0xd0   : > { %v146_v8 = vadd.f32 %v145_v7, %v144_v6 }
  0xd2   : > { %v147_v9 = vrot.slane %v146_v8, 2 }
  0xd4   : > { %v148_v10 = vadd.f32 %v147_v9, %v146_v8 }
  0xd6   : > { %v149_v11 = vrot.slane %v148_v10, 1 }
  0xd8   : > { %v150_v12 = vadd.f32 %v149_v11, %v148_v10 }
  0xda   : > { %v151_v13 = vmul.f32 0.00390625, %v150_v12 }
  0xdc   : > { %v152_v14 = vsub.f32 %v135_v0, %v151_v13  ;;  %v153_v15 = vsub.f32 %v136_v1, %v151_v13 }
  0xde   : > { %v154_v16 = vmul.f32 %v152_v14, %v152_v14  ;;  %v155_v18 = vmul.f32 %v153_v15, %v153_v15 }
  0xe0   : > { %v156_v17 = vsel %vm137_vm0, %v154_v16, 0.0  ;;  %v159_v19 = vsel %vm137_vm0, %v155_v18, 0.0 }
  0xe1   : > { %157 = vadd.xlane.f32.xlu1 %v156_v17 }
  0xe5   : > { %160 = vadd.xlane.f32.xlu1 %v159_v19 }
 0x16e   : > { %v158_v20 = vpop.xlane.xlu1 %157 }
 0x172   : > { %v161_v21 = vpop.xlane.xlu1 %160 }
 0x173   : > { %v162_v22 = vadd.f32 %v161_v21, %v158_v20 }
 0x175   : > { %v163_v23 = vrot.slane %v162_v22, 4 }
 0x177   : > { %v164_v24 = vadd.f32 %v163_v23, %v162_v22 }
 0x179   : > { %v165_v25 = vrot.slane %v164_v24, 2 }
 0x17b   : > { %v166_v26 = vadd.f32 %v165_v25, %v164_v24 }
 0x17d   : > { %v167_v27 = vrot.slane %v166_v26, 1 }
 0x17f   : > { %v168_v28 = vadd.f32 %v167_v27, %v166_v26 }
 0x181   : > { %v169_v29 = vmul.f32 0.003921569, %v168_v28 }
 0x183   : > { %v170_v30 = vadd.f32 0.0001, %v169_v29 }
 0x185   : > { %v171_v31 = vmul.f32 4.0, %v170_v30 }
 0x187   : > { %342 = vrcp.f32 %v171_v31 }
 0x191   : > { %v343_v32 = vpop.eup %342 }
 0x192   : > { %v173_v33 = vmul.f32 %v343_v32, %v154_v16  ;;  %v174_v34 = vmul.f32 %v343_v32, %v155_v18 }
 0x194   : > { %v175_v35 = vadd.f32 0.5, %v173_v33  ;;  %v176_v36 = vadd.f32 0.5, %v174_v34 }
 0x196   : > { %v177_v37 = vmul.f32 0.5, %v175_v35  ;;  %v178_v38 = vmul.f32 0.5, %v176_v36 }
 0x198   : > { %344 = vtanh.f32 %v177_v37 }
 0x199   : > { %346 = vtanh.f32 %v178_v38 }
 0x1a2   : > { %v345_v39 = vpop.eup %344 }
 0x1a3   : > { %v347_v40 = vpop.eup %346  ;;  %v181_v41 = vmul.f32 0.5, %v345_v39 }
 0x1a4   : > { %v182_v42 = vmul.f32 0.5, %v347_v40 }
 0x1a5   : > { %v183_v43 = vadd.f32 0.5, %v181_v41 }
 0x1a6   : > { %v184_v44 = vadd.f32 0.5, %v182_v42 }
 0x1a7   : > { %v185_v45 = vmul.f32 %v183_v43, %v135_v0 }
 0x1a8   : > { %v186_v46 = vmul.f32 %v184_v44, %v136_v1 }
 0x1a9   : > { %187 = vst.msk [vmem:[%s134_s25] sm:$0xff] %vm137_vm0, %v185_v45 }
 0x1aa   : > { %188 = vst.msk [vmem:[%s134_s25 + $0x8] sm:$0xff] %vm137_vm0, %v186_v46 }
 0x1ab   : > { %391 = shalt.err (!%p388_p1)
}
 0x1ac   : > { %s392_s13 = scalar_lea.hbm %s585_s2, 256  ;;  %s396_s20 = scalar_lea.hbm %s633_s1, 2048 }
 0x1ad   : > { %p393_p3 = scmp.ne.s32.totalorder %s585_s2, %s392_s13  ;;  %p397_p0 = scmp.lt.u32.totalorder %s585_s2, %s633_s1 }
 0x1ae   : > { %p398_p2 = scmp.lt.u32.totalorder %s396_s20, %s392_s13  ;;  %p400_p6 = scmp.lt.u32.totalorder %s392_s13, %s585_s2 }
 0x1af   : > { %p394_p4 = pnand %p393_p3, %p640_p10 }
 0x1b0   : > { %p399_p7 = por %p398_p2, %p397_p0 }
 0x1b1   : > { %p395_p5 = pneg %p394_p4 }
 0x1b2   : > { %p401_p11 = por %p400_p6, %p399_p7 }
 0x1b4   : > { %p402_p12 = pnand %p401_p11, %p395_p5 }
 0x1b6   : > { %405 = shalt.err (!%p402_p12)
}
 0x1b7   : > { %s450_s24 = smov 128   ;;  %s451_s26 = smov 8  }
 0x1b8   : > { %294 = dma.vmem_to_hbm [thread:$0]  (%p640_p10), %s587_s27, 256, %s585_s2, %s190_s10, %s450_s24, %s450_s24, %s451_s26  }
 0x1b9 PF: > { %p305_p8 = scmp.ge.s32.totalorder %s444_s9, 2  ;;  %s218_s30 = sand.u32 1, %s432_s6  }
 0x1ba   : > { %p641_p9 = scmp.ne.s32.totalorder %s638_s19, 0  ;;  %s219_s17 = scalar_lea.sflag [#allocation4], %s218_s30 }
 0x1bc   : > { %p301_p13 = pnand %p305_p8, %p641_p9 }
 0x1be   : > { %427 = dma.done.wait (!%p301_p13), %s219_s17, 256  }
 0x1bf   : > { %429 = vsyncadd (!%p301_p13), %s219_s17, 4294967040  ;;  %p14_p1 = scmp.ge.s32.totalorder %s487_s12, 10   ;;  %s642_s6 = smov %s436_s7 }
 0x1c0   : > { %s643_s7 = smov %s440_s8  ;;  %s644_s8 = smov %s499_s15 }
 0x1c1   : > { %s645_s9 = smov %s487_s12  ;;  %16 = sbr.rel (!%p14_p1) target bundleno = 5 (0x5), region = 69 }
 0x1c8   :  { %224 = vsyncpa [#allocation3], 1 }
 0x1c9   :  { %226 = vsyncpa [#allocation3 + $0x1], 1 }
 0x1ca   :  { %227 = vsyncpa [#allocation4], 1 }
 0x1cb   :  { %229 = vsyncpa [#allocation4 + $0x1], 1 }

</bundles_post_ra>
